<compile_context>
chip_gen: v7x
topology: tpu7x:2x2x1
jax: 0.10.0
libtpu: 0.0.40
codegen_flags: <defaults>
</compile_context>

<pallas_src>
import functools

import jax
import jax.numpy as jnp
from jax.experimental import pallas as pl
from jax.experimental.pallas import tpu as pltpu

_NEG_INF = -1e30   # pad value for extra vocab lanes; exp() underflows to 0.


def _gather_tile(idx_ref, table_ref):
    """(tm, Vp) logits tile = one_hot(idx) @ table, computed on the MXU.

    One-hot rows select exact table rows; f32 inputs + HIGHEST precision keep
    the gathered logits bit-exact (review: the table must stay f32).
    """
    tok = idx_ref[...]                                      # (tm, 1) int32
    tm = tok.shape[0]
    v = table_ref.shape[0]
    col = jax.lax.broadcasted_iota(jnp.int32, (tm, v), 1)
    onehot = (col == tok).astype(jnp.float32)               # (tm, V)
    return jnp.dot(onehot, table_ref[...],
                   precision=jax.lax.Precision.HIGHEST,
                   preferred_element_type=jnp.float32)      # (tm, Vp)


def bigram_kernel(*refs, with_targets, write_logits):
    if with_targets:
        idx_ref, tgt_ref, table_ref, *out_refs = refs
    else:
        idx_ref, table_ref, *out_refs = refs
        tgt_ref = None

    # Vectorized gather -> tile stays in registers; no store-then-reload.
    tile = _gather_tile(idx_ref, table_ref)                 # (tm, Vp) f32

    if write_logits:
        logits_ref = out_refs[0]
        out_refs = out_refs[1:]
        logits_ref[...] = tile                              # one unmasked lane-dense store

    if with_targets:
        nll_ref = out_refs[0]
        tm, vp = tile.shape
        tgt = tgt_ref[...]                                  # (tm, 1) int32

        # Fused log-softmax, single exp pass; padded lanes hold -1e30 -> exp == 0.
        m = jnp.max(tile, axis=-1, keepdims=True)           # (tm, 1)
        p = jnp.exp(tile - m)
        lse = jnp.log(jnp.sum(p, axis=-1, keepdims=True)) + m

        # Target logit via masked select (no one-hot temporary needed here).
        col = jax.lax.broadcasted_iota(jnp.int32, (tm, vp), 1)
        tgt_logit = jnp.sum(jnp.where(col == tgt, tile, 0.0),
                            axis=-1, keepdims=True)

        valid = (tgt != -1).astype(jnp.float32)             # masks ignore_index & padded rows
        nll_ref[...] = (lse - tgt_logit) * valid            # (tm, 1) per-row NLL


def bigram_forward(idx, table, targets=None, *, tm=512, return_logits=True):
    """Pallas forward for the Bigram module.

    idx: (B, T) int32, table: (V, V) float32 (the nn.Parameter), targets:
    (B, T) int32 with ignore_index == -1, or None.
    Returns (logits (B, T, V) f32, loss scalar or None).  For large B*T sweep
    tm in 256-1024; set return_logits=False to skip the logits HBM writeback
    when only the loss is needed.
    """
    B, T = idx.shape
    V = table.shape[0]
    N = B * T

    Vp = pl.cdiv(V, 128) * 128        # lane-align vocab -> unmasked full-width stores
    # Large row tiles amortize the ~0.35us/step overhead; clamp for tiny inputs
    # (multiple of 8, at least 2 tiles so small tests still exercise the grid).
    tm_eff = min(tm, max(8, pl.cdiv(pl.cdiv(N, 2), 8) * 8))
    Np = pl.cdiv(N, tm_eff) * tm_eff
    num_tiles = Np // tm_eff

    table_p = table.astype(jnp.float32)
    if Vp != V:
        table_p = jnp.pad(table_p, ((0, 0), (0, Vp - V)), constant_values=_NEG_INF)

    idx_p = jnp.pad(idx.reshape(N).astype(jnp.int32), (0, Np - N)).reshape(Np, 1)

    # VMEM budget: double-buffered resident table + double-buffered logits tile
    # + small (tm, 1) vectors, with headroom.  Guard vocabs that cannot fit the
    # resident-table design (v7x only has 64 MiB physical VMEM).
    table_bytes = 2 * V * Vp * 4
    if table_bytes > 48 * 1024 * 1024:
        # TODO(synk): large vocabularies need V-axis tiling + online logsumexp.
        raise NotImplementedError("vocab too large for the VMEM-resident table design")
    vmem_needed = table_bytes + 4 * tm_eff * Vp * 4 + (1 << 20)
    vmem_limit = min(max(vmem_needed, 32 * 1024 * 1024), 96 * 1024 * 1024)

    table_spec = pl.BlockSpec((V, Vp), lambda i: (0, 0))         # VMEM-resident table
    idx_spec = pl.BlockSpec((tm_eff, 1), lambda i: (i, 0))
    tgt_spec = pl.BlockSpec((tm_eff, 1), lambda i: (i, 0))
    nll_spec = pl.BlockSpec((tm_eff, 1), lambda i: (i, 0))
    logits_spec = pl.BlockSpec((tm_eff, Vp), lambda i: (i, 0))   # lane-dense output tile

    if targets is None:
        logits_p = pl.pallas_call(
            functools.partial(bigram_kernel, with_targets=False, write_logits=True),
            out_shape=jax.ShapeDtypeStruct((Np, Vp), jnp.float32),
            grid_spec=pltpu.PrefetchScalarGridSpec(
                num_scalar_prefetch=0,
                grid=(num_tiles,),
                in_specs=[idx_spec, table_spec],
                out_specs=logits_spec,
            ),
            compiler_params=pltpu.CompilerParams(
                dimension_semantics=("parallel",),    # independent tiles -> megacore
                vmem_limit_bytes=vmem_limit,
            ),
            cost_estimate=pl.CostEstimate(            # advisory: pure memory-bound copy
                flops=0, transcendentals=0,
                bytes_accessed=Np * Vp * 4 + V * Vp * 4 + Np * 4,
            ),
        )(idx_p, table_p)
        return logits_p[:N, :V].reshape(B, T, V), None

    tgt_p = jnp.pad(targets.reshape(N).astype(jnp.int32), (0, Np - N),
                    constant_values=-1).reshape(Np, 1)

    if return_logits:
        out_shape = (jax.ShapeDtypeStruct((Np, Vp), jnp.float32),
                     jax.ShapeDtypeStruct((Np, 1), jnp.float32))
        out_specs = (logits_spec, nll_spec)
    else:
        out_shape = jax.ShapeDtypeStruct((Np, 1), jnp.float32)
        out_specs = nll_spec

    outs = pl.pallas_call(
        functools.partial(bigram_kernel, with_targets=True, write_logits=return_logits),
        out_shape=out_shape,
        grid_spec=pltpu.PrefetchScalarGridSpec(
            num_scalar_prefetch=0,
            grid=(num_tiles,),
            in_specs=[idx_spec, tgt_spec, table_spec],
            out_specs=out_specs,
        ),
        compiler_params=pltpu.CompilerParams(
            dimension_semantics=("parallel",),        # per-row NLL -> no cross-tile state
            vmem_limit_bytes=vmem_limit,
        ),
        cost_estimate=pl.CostEstimate(
            flops=2 * Np * V * Vp + 8 * Np * Vp,
            transcendentals=Np * Vp + Np,
            bytes_accessed=(Np * Vp * 4 if return_logits else 0) + V * Vp * 4 + Np * 12,
        ),
    )(idx_p, tgt_p, table_p)

    if return_logits:
        logits_p, nll_p = outs
        logits = logits_p[:N, :V].reshape(B, T, V)
    else:
        nll_p = outs
        logits = None

    # Tiny final reduction (N scalars) in plain JAX; the kernel already masked
    # ignore_index / padded rows.
    count = jnp.sum((targets.reshape(N) != -1).astype(jnp.float32))
    # TODO(synk): PyTorch returns NaN when every target is ignored; we clamp to 1.
    loss = jnp.sum(nll_p[:N, 0]) / jnp.maximum(count, 1.0)
    return logits, loss


def _reference(idx, table, targets):
    logits = table[idx]                                          # (B, T, V)
    lf = logits.reshape(-1, table.shape[0])
    tf = targets.reshape(-1)
    lse = jax.nn.logsumexp(lf, axis=-1)
    tgt_logit = jnp.take_along_axis(lf, jnp.maximum(tf, 0)[:, None], axis=-1)[:, 0]
    valid = (tf != -1).astype(jnp.float32)
    loss = jnp.sum((lse - tgt_logit) * valid) / jnp.maximum(jnp.sum(valid), 1.0)
    return logits, loss


if __name__ == "__main__":
    V = 32   # vocab_size
    B, T = 2, 8

    key = jax.random.PRNGKey(0)
    k_tab, k_idx, k_tgt = jax.random.split(key, 3)

    # nn.Parameter is initialized to zeros in the module; a deterministic random
    # table is used instead so the kernel output is non-trivial to check.
    table = 0.1 * jax.random.normal(k_tab, (V, V), dtype=jnp.float32)
    idx = jax.random.randint(k_idx, (B, T), 0, V, dtype=jnp.int32)
    targets = jax.random.randint(k_tgt, (B, T), 0, V, dtype=jnp.int32)
    targets = targets.at[0, 0].set(-1).at[1, 3].set(-1)   # exercise ignore_index

    logits, loss = bigram_forward(idx, table, targets)
    jax.block_until_ready((logits, loss))

    ref_logits, ref_loss = _reference(idx, table, targets)
    assert logits.shape == (B, T, V)
    assert jnp.allclose(logits, ref_logits, atol=1e-5), "logits mismatch"
    assert jnp.allclose(loss, ref_loss, atol=1e-5), "loss mismatch"

    # Loss-only mode skips the (N, Vp) f32 logits HBM writeback entirely.
    no_logits, loss_only = bigram_forward(idx, table, targets, return_logits=False)
    jax.block_until_ready(loss_only)
    assert no_logits is None
    assert jnp.allclose(loss_only, ref_loss, atol=1e-5), "loss-only mismatch"

    # Inference path (targets=None) mirrors forward(idx) -> (logits, None); no CE math.
    logits_only, no_loss = bigram_forward(idx, table, None)
    jax.block_until_ready(logits_only)
    assert no_loss is None
    assert jnp.allclose(logits_only, ref_logits, atol=1e-5)

    print("KERNEL_OK")
</pallas_src>

<mosaic_0001>
module attributes {stable_mosaic.version = 11 : i64} {
  func.func @bigram_kernel(%arg0: i32, %arg1: memref<8x1xi32, #tpu.memory_space<vmem>>, %arg2: memref<8x1xi32, #tpu.memory_space<vmem>>, %arg3: memref<32x128xf32, #tpu.memory_space<vmem>>, %arg4: memref<8x128xf32, #tpu.memory_space<vmem>>, %arg5: memref<8x1xf32, #tpu.memory_space<vmem>>) attributes {dimension_semantics = [#tpu.dimension_semantics<parallel>], iteration_bounds = array<i64: 2>, scalar_prefetch = 0 : i64, scratch_operands = 0 : i64, tpu.core_type = #tpu.core_type<tc>, window_params = [{transform_indices = @transform_0, window_bounds = array<i64: 8, 1>}, {transform_indices = @transform_1, window_bounds = array<i64: 8, 1>}, {pipeline_mode = #tpu.pipeline_mode<synchronous>, transform_indices = @transform_2, window_bounds = array<i64: 32, 128>}, {transform_indices = @transform_3, window_bounds = array<i64: 8, 128>}, {transform_indices = @transform_4, window_bounds = array<i64: 8, 1>}]} {
    %c0 = arith.constant 0 : index
    %c0_0 = arith.constant 0 : index
    %0 = vector.load %arg1[%c0, %c0_0] : memref<8x1xi32, #tpu.memory_space<vmem>>, vector<8x1xi32>
    %1 = tpu.iota {dimensions = array<i32: 1>} : vector<8x32xi32>
    %2 = vector.broadcast %0 : vector<8x1xi32> to vector<8x32xi32>
    %3 = arith.cmpi eq, %1, %2 : vector<8x32xi32>
    %4 = arith.extui %3 : vector<8x32xi1> to vector<8x32xi32>
    %5 = arith.sitofp %4 : vector<8x32xi32> to vector<8x32xf32>
    %c0_1 = arith.constant 0 : index
    %c0_2 = arith.constant 0 : index
    %6 = vector.load %arg3[%c0_1, %c0_2] : memref<32x128xf32, #tpu.memory_space<vmem>>, vector<32x128xf32>
    %cst = arith.constant dense<0.000000e+00> : vector<8x128xf32>
    %7 = tpu.matmul %5, %6, %cst {dimension_numbers = #tpu.dot_dimension_numbers<[1], [0], [0], [1], [0, 0, 1, 1], [], []>, precision = #tpu.contract_precision<fp32>} : vector<8x32xf32>, vector<32x128xf32>, vector<8x128xf32> -> vector<8x128xf32>
    %c0_3 = arith.constant 0 : index
    %c0_4 = arith.constant 0 : index
    %8 = vector.load %arg4[%c0_3, %c0_4] : memref<8x128xf32, #tpu.memory_space<vmem>>, vector<8x128xf32>
    tpu.vector_store %arg4[%c0_3, %c0_4], %7 {strides = array<i32>} : memref<8x128xf32, #tpu.memory_space<vmem>>, vector<8x128xf32>,
    %c0_5 = arith.constant 0 : index
    %c0_6 = arith.constant 0 : index
    %9 = vector.load %arg2[%c0_5, %c0_6] : memref<8x1xi32, #tpu.memory_space<vmem>>, vector<8x1xi32>
    %cst_7 = arith.constant dense<0xFF800000> : vector<8xf32>
    %10 = vector.multi_reduction <maximumf>, %7, %cst_7 [1] : vector<8x128xf32> to vector<8xf32>
    %11 = vector.shape_cast %10 : vector<8xf32> to vector<8x1xf32>
    %12 = vector.broadcast %11 : vector<8x1xf32> to vector<8x128xf32>
    %13 = arith.subf %7, %12 : vector<8x128xf32>
    %14 = math.exp %13 : vector<8x128xf32>
    %cst_8 = arith.constant dense<0.000000e+00> : vector<8xf32>
    %15 = vector.multi_reduction <add>, %14, %cst_8 [1] : vector<8x128xf32> to vector<8xf32>
    %16 = vector.shape_cast %15 : vector<8xf32> to vector<8x1xf32>
    %17 = math.log %16 : vector<8x1xf32>
    %18 = arith.addf %17, %11 : vector<8x1xf32>
    %19 = tpu.iota {dimensions = array<i32: 1>} : vector<8x128xi32>
    %20 = vector.broadcast %9 : vector<8x1xi32> to vector<8x128xi32>
    %21 = arith.cmpi eq, %19, %20 : vector<8x128xi32>
    %cst_9 = arith.constant 0.000000e+00 : f32
    %22 = vector.broadcast %cst_9 : f32 to vector<8x128xf32>
    %23 = arith.select %21, %7, %22 : vector<8x128xi1>, vector<8x128xf32>
    %cst_10 = arith.constant dense<0.000000e+00> : vector<8xf32>
    %24 = vector.multi_reduction <add>, %23, %cst_10 [1] : vector<8x128xf32> to vector<8xf32>
    %25 = vector.shape_cast %24 : vector<8xf32> to vector<8x1xf32>
    %c-1_i32 = arith.constant -1 : i32
    %26 = vector.broadcast %c-1_i32 : i32 to vector<8x1xi32>
    %27 = arith.cmpi ne, %9, %26 : vector<8x1xi32>
    %28 = arith.extui %27 : vector<8x1xi1> to vector<8x1xi32>
    %29 = arith.sitofp %28 : vector<8x1xi32> to vector<8x1xf32>
    %30 = arith.subf %18, %25 : vector<8x1xf32>
    %31 = arith.mulf %30, %29 : vector<8x1xf32>
    %c0_11 = arith.constant 0 : index
    %c0_12 = arith.constant 0 : index
    %32 = vector.load %arg5[%c0_11, %c0_12] : memref<8x1xf32, #tpu.memory_space<vmem>>, vector<8x1xf32>
    tpu.vector_store %arg5[%c0_11, %c0_12], %31 {strides = array<i32>} : memref<8x1xf32, #tpu.memory_space<vmem>>, vector<8x1xf32>,
    return
  }
  func.func @transform_0(%arg0: i32) -> (i32, i32) {
    %c0_i32 = arith.constant 0 : i32
    %c0_i32_0 = arith.constant 0 : i32
    return %arg0, %c0_i32 : i32, i32
  }
  func.func @transform_1(%arg0: i32) -> (i32, i32) {
    %c0_i32 = arith.constant 0 : i32
    %c0_i32_0 = arith.constant 0 : i32
    return %arg0, %c0_i32 : i32, i32
  }
  func.func @transform_2(%arg0: i32) -> (i32, i32) {
    %c0_i32 = arith.constant 0 : i32
    %c0_i32_0 = arith.constant 0 : i32
    %c0_i32_1 = arith.constant 0 : i32
    return %c0_i32, %c0_i32_0 : i32, i32
  }
  func.func @transform_3(%arg0: i32) -> (i32, i32) {
    %c0_i32 = arith.constant 0 : i32
    %c0_i32_0 = arith.constant 0 : i32
    return %arg0, %c0_i32 : i32, i32
  }
  func.func @transform_4(%arg0: i32) -> (i32, i32) {
    %c0_i32 = arith.constant 0 : i32
    %c0_i32_0 = arith.constant 0 : i32
    return %arg0, %c0_i32 : i32, i32
  }
}

</mosaic_0001>

<bundles_post_ra>
// kernel: tpu_custom_call.1
= control target key start
LH: loop header
LB: loop body
LE: loop exit
PB: predicated region body
PF: predicated region fallthrough
CT: control target
= control target key end

     0   :  { %10 = vsyncpa [#allocation3], 0  ;;  %s1337_s0 = inlined_call_operand.vmem [shape: s32[16,1], index: 0, kind: input, shape index: {}]   ;;  %s1338_s1 = inlined_call_operand.vmem [shape: s32[16,1], index: 1, kind: input, shape index: {}]   ;;  %s1339_s2 = inlined_call_operand.vmem [shape: f32[32,128], index: 2, kind: input, shape index: {}]   ;;  %s1340_s3 = inlined_call_operand.hbm [shape: f32[16,128], index: 3, kind: output, shape index: {0}]   ;;  %s1341_s4 = inlined_call_operand.vmem [shape: f32[16,1], index: 4, kind: output, shape index: {1}]  }
   0x1   :  { %12 = vsyncpa [#allocation3 + $0x1], 0  ;;  %s1166_s15 = smov 0   ;;  %s1168_s16 = smov 0  }
   0x2   :  { %s1170_s17 = smov 0   ;;  %s1172_s18 = smov 0  }
   0x3 LB: > { %s1187_s19 = sadd.s32 4294967295, %s1134_s18   ;;  %s865_s20 = sadd.s32 4294967294, %s1134_s18   ;;  %s1134_s18 = sphi %s1172_s18, %s1347_s18   ;;  %s1130_s17 = sphi %s1170_s17, %s1346_s17   ;;  %s1126_s16 = sphi %s1168_s16, %s1345_s16   ;;  %s1122_s15 = sphi %s1166_s15, %s1344_s15  }
   0x4   : > { %s1191_s21 = sadd.s32 1, %s1134_s18   ;;  %s98_s22 = sadd.s32 1, %s1130_s17 }
   0x5   : > { %s95_s23 = ssub.s32 %s1134_s18, %s1191_s21  ;;  %p108_p0 = scmp.ne.s32.totalorder %s1130_s17, %s1126_s16 }
   0x6   : > { %p96_p1 = scmp.eq.s32.totalorder %s95_s23, 0  ;;  %p109_p2 = scmp.eq.s32.totalorder %s1187_s19, 1 }
   0x7   : > { %p114_p3 = scmp.ne.s32.totalorder %s1126_s16, %s1122_s15  ;;  %p115_p4 = scmp.eq.s32.totalorder %s865_s20, 1 }
   0x8   : > { %s1202_s24 = scalar_select %p96_p1, %s1130_s17, %s98_s22  }
   0x9   : > { %p1204_p5 = por %p109_p2, %p108_p0  ;;  %p1208_p6 = por %p115_p4, %p114_p3 }
   0xa   : > { %p868_p7 = scmp.ge.s32.totalorder %s1134_s18, 1  ;;  %p176_p8 = scmp.lt.s32.totalorder %s1134_s18, 3 }
   0xc   : > { %p177_p9 = pnand %p868_p7, %p176_p8 }
   0xd   : > { %p209_p10 = scmp.lt.s32.totalorder (!%p177_p9), %s1187_s19, 1  ;;  %v1136_v0 = vmov (!%p177_p9), 0   ;;  %v1137_v1 = vmov (!%p177_p9), 0.0|0.0   ;;  %v230_v2 = vld [vmem:[%s1339_s2] sm:$0xff] (!%p177_p9)  ;;  %v231_v3 = vld [vmem:[%s1339_s2 + $0x8] sm:$0xff] (!%p177_p9)  ;;  %v232_v8 = vld [vmem:[%s1339_s2 + $0x10] sm:$0xff] (!%p177_p9)  ;;  %v222_v37 = vlaneseq (!%p177_p9) }
   0xe   : > { %180 = sbr.rel (%p177_p9) target bundleno = 714 (0x2ca), region = 32  ;;  %1066 = vset.pattern.permute.xlu0 (!%p177_p9), %v1136_v0  ;;  %996 = vmatprep.subr.bf16.mxu0 (!%p177_p9), %v1137_v1  ;;  %v239_v4 = vand.u32 (!%p177_p9), 4294901760, %v230_v2  ;;  %v242_v5 = vand.u32 (!%p177_p9), 4294901760, %v231_v3  ;;  %v233_v9 = vld [vmem:[%s1339_s2 + $0x18] sm:$0xff] (!%p177_p9)  ;;  %v245_v10 = vand.u32 (!%p177_p9), 4294901760, %v232_v8  ;;  %vm1138_vm0 = vmmov (!%p177_p9), 0  }
   0xf   : > { %978 = vmatprep.subr.bf16.mxu1 (!%p177_p9), %v1137_v1  ;;  %1067 = vset.pattern.permute.xlu1 (!%p177_p9), %v1136_v0  ;;  %v248_v11 = vand.u32 (!%p177_p9), 4294901760, %v233_v9  ;;  %v1139_v17 = vmov (!%p177_p9), 0.0   ;;  %v223_v38 = vand.u32 (!%p177_p9), 127, %v222_v37  ;;  %vm234_vm1 = vcmask (!%p177_p9), 261120   ;;  %s200_s23 = sand.u32 (!%p177_p9), 1, %s1126_s16   ;;  %s879_s29 = sshll.u32 (!%p177_p9), %s1187_s19, 7 }
  0x10   : > { %v1230_v6 = vpack.c.bf16 (!%p177_p9), %v242_v5, %v239_v4  ;;  %v1241_v12 = vsub.f32 (!%p177_p9), %v230_v2, %v239_v4  ;;  %v326_v13 = vsub.f32 (!%p177_p9), %v231_v3, %v242_v5  ;;  %v1244_v15 = vsub.f32 (!%p177_p9), %v232_v8, %v245_v10  ;;  %953 = vmatprep.mubr.msk.f32.mxu0 (!%p177_p9), %vm1138_vm0, %v1139_v17  ;;  %s1295_s8 = scalar_lea.hbm (!%p177_p9), %s1340_s3, %s879_s29  ;;  %s1140_s11 = smov (!%p177_p9), [#allocation2]  }
  0x11   : > { %v982_v14 = vpack.c.bf16 (!%p177_p9), %v248_v11, %v245_v10  ;;  %v1246_v16 = vsub.f32 (!%p177_p9), %v233_v9, %v248_v11  ;;  %920 = vmatprep.mubr.msk.f32.mxu1 (!%p177_p9), %vm1138_vm0, %v1139_v17  ;;  %s1076_s12 = sshll.u32 (!%p177_p9), %s1140_s11, 4  ;;  %s1077_s12 = int_to_ptr.vmem [resolvable:$false] %s1076_s12 }
  0x12   : > { %998 = vmatpush3.bf16.msra.mxu0 (!%p177_p9), %v1230_v6  ;;  %980 = vmatpush3.bf16.msra.mxu1 (!%p177_p9), %v1230_v6  ;;  %v320_v18 = vand.u32 (!%p177_p9), 4294901760, %v1241_v12  ;;  %v327_v19 = vand.u32 (!%p177_p9), 4294901760, %v326_v13  ;;  %v334_v25 = vand.u32 (!%p177_p9), 4294901760, %v1244_v15  ;;  %v991_v34 = vpack.c.bf16 (!%p177_p9), %v326_v13, %v1241_v12  ;;  %s1078_s13 = scalar_lea.vmem (!%p177_p9), %s1077_s12, 256 }
  0x13   : > { %999 = vmatprep.subr.bf16.mxu0 (!%p177_p9), %v1137_v1  ;;  %981 = vmatprep.subr.bf16.mxu1 (!%p177_p9), %v1137_v1  ;;  %v341_v26 = vand.u32 (!%p177_p9), 4294901760, %v1246_v16  ;;  %v994_v35 = vpack.c.bf16 (!%p177_p9), %v1246_v16, %v1244_v15 }
  0x14   : > { %v1003_v20 = vpack.c.bf16 (!%p177_p9), %v327_v19, %v320_v18  ;;  %v321_v21 = vsub.f32 (!%p177_p9), %v1241_v12, %v320_v18  ;;  %v328_v22 = vsub.f32 (!%p177_p9), %v326_v13, %v327_v19  ;;  %v335_v29 = vsub.f32 (!%p177_p9), %v1244_v15, %v334_v25 }
  0x15   : > { %s210_s27 = scalar_select %p209_p10, %s1187_s19, 1  ;;  %v1006_v28 = vpack.c.bf16 %v341_v26, %v334_v25  ;;  %v342_v30 = vsub.f32 %v1246_v16, %v341_v26 }
  0x16   : > { %1001 = vmatpush3.bf16.msra.mxu0 %v982_v14  ;;  %983 = vmatpush3.bf16.msra.mxu1 %v982_v14  ;;  %v322_v23 = vand.u32 4294901760, %v321_v21  ;;  %v329_v24 = vand.u32 4294901760, %v328_v22  ;;  %v336_v31 = vand.u32 4294901760, %v335_v29 }
  0x17   : > { %s1224_s6 = sshll.u32 %s210_s27, 3  ;;  %1002 = vmatprep.subr.bf16.mxu0 %v1137_v1  ;;  %984 = vmatprep.subr.bf16.mxu1 %v1137_v1  ;;  %v343_v32 = vand.u32 4294901760, %v342_v30  ;;  %s869_s27 = sshll.u32 %s200_s23, 3 }
  0x18   : > { %s212_s9 = scalar_lea.vmem %s1337_s0, %s1224_s6  ;;  %v985_v27 = vpack.c.bf16 %v329_v24, %v322_v23  ;;  %s216_s22 = scalar_lea.vmem %s1338_s1, %s1224_s6 }
  0x19   : > { %v221_v7 = vld [vmem:[%s212_s9] sm:$0xff]  ;;  %v988_v33 = vpack.c.bf16 %v343_v32, %v336_v31  ;;  %s202_s28 = scalar_lea.vmem [#allocation2], %s869_s27  ;;  %s750_s9 = scalar_lea.sflag [#allocation3], %s200_s23 }
  0x1a   : > { %225 = vperm.xlu0 %1066, %v221_v7   ;;  %v1267_v36 = vld [vmem:[%s216_s22] sm:$0xff]  ;;  %s767_s30 = sshll.u32 %s202_s28, 4  ;;  %s768_s30 = int_to_ptr.vmem [resolvable:$true] %s767_s30 }
  0x1b   : > { %736 = vperm.xlu1 %1067, %v1267_v36   ;;  %s1072_s10 = scalar_lea.vmem %s768_s30, 128  ;;  %p1079_p0 = scmp.lt.s32.totalorder %s768_s30, %s1077_s12 }
  0x1c   : > { %p1073_p11 = scmp.ne.s32.totalorder %s768_s30, %s1072_s10  ;;  %p1080_p1 = scmp.lt.s32.totalorder %s1078_s13, %s1072_s10 }
  0x1e   : > { %p1074_p12 = pnand %p1073_p11, %p1204_p5  ;;  %p1081_p2 = por %p1080_p1, %p1079_p0 }
  0x20   : > { %p1075_p13 = pneg %p1074_p12 }
  0x22   : > { %p1082_p3 = pnand %p1081_p2, %p1075_p13 }
  0x99   : > { %v226_v39 = vpop.permute.xlu0 %225 }
  0x9a   : > { %vm227_vm2 = vcmp.eq.s32.totalorder %v223_v38, %v226_v39  ;;  %v737_v49 = vpop.permute.xlu1 %736 }
  0x9b   : > { %v873_v40 = vsel %vm227_vm2, 1.0, %v1139_v17  ;;  %vm738_vm3 = vcmp.eq.s32.totalorder %v223_v38, %v737_v49 }
  0x9c   : > { %v236_v41 = vsel %vm234_vm1, %v873_v40, 0 }
  0x9d   : > { %v308_v42 = vsub.f32 %v236_v41, %v236_v41 }
  0x9f   : > { %v309_v43 = vand.u32 4294901760, %v308_v42 }
  0xa1   : > { %954 = vmatmul.mubr.f32.vlgmr.msra.gmra.mrb[0].mxu0 %v309_v43  ;;  %v310_v44 = vsub.f32 %v308_v42, %v309_v43 }
  0xa2   : > { %1004 = vmatpush3.bf16.msra.mxu0 %v1003_v20  ;;  %964 = vmatprep.mubr.msk.f32.mxu0 %vm1138_vm0, %v1139_v17 }
  0xa3   : > { %v311_v45 = vand.u32 4294901760, %v310_v44  ;;  %1005 = vmatprep.subr.bf16.mxu0 %v1137_v1 }
  0xa5   : > { %921 = vmatmul.mubr.f32.vlgmr.msra.gmra.mrb[0].mxu1 %v311_v45 }
  0xa6   : > { %986 = vmatpush3.bf16.msra.mxu1 %v985_v27  ;;  %1007 = vmatpush3.bf16.msra.mxu0 %v1006_v28 }
  0xa7   : > { %987 = vmatprep.subr.bf16.mxu1 %v1137_v1  ;;  %1008 = vmatprep.subr.bf16.mxu0 %v1137_v1 }
  0xa8   : > { %931 = vmatprep.mubr.msk.f32.mxu1 %vm1138_vm0, %v1139_v17 }
  0xa9   : > { %965 = vmatmul.mubr.msk.f32.vlgmr.msra.gmra.mrb[0].mxu0 %vm234_vm1, %v873_v40 }
  0xaa   : > { %989 = vmatpush3.bf16.msra.mxu1 %v988_v33  ;;  %1010 = vmatpush3.bf16.msra.mxu0 %v1230_v6 }
  0xab   : > { %990 = vmatprep.subr.bf16.mxu1 %v1137_v1  ;;  %1011 = vmatprep.subr.bf16.mxu0 %v1137_v1 }
  0xac   : > { %975 = vmatprep.mubr.msk.f32.mxu0 %vm1138_vm0, %v1139_v17 }
  0xad   : > { %932 = vmatmul.mubr.msk.f32.vlgmr.msra.gmra.mrb[0].mxu1 %vm234_vm1, %v873_v40 }
  0xae   : > { %992 = vmatpush3.bf16.msra.mxu1 %v991_v34  ;;  %1013 = vmatpush3.bf16.msra.mxu0 %v982_v14 }
  0xaf   : > { %993 = vmatprep.subr.bf16.mxu1 %v1137_v1  ;;  %942 = vmatprep.mubr.msk.f32.mxu1 %vm1138_vm0, %v1139_v17 }
  0xb1   : > { %976 = vmatmul.mubr.msk.f32.vlgmr.msra.gmra.mrb[0].mxu0 %vm234_vm1, %v873_v40 }
  0xb2   : > { %995 = vmatpush3.bf16.msra.mxu1 %v994_v35 }
  0xb5   : > { %943 = vmatmul.mubr.f32.vlgmr.msra.gmra.mrb[0].mxu1 %v308_v42 }
 0x184   : > { %v719_v46 = vpop.f32.mrb[0].mxu0 }
 0x185   : > { %v977_v47 = vpop.f32.mrb[1].mxu0 }
 0x188   : > { %v484_v48 = vpop.f32.mrb[0].mxu1 }
 0x189   : > { %v1014_v50 = vadd.f32 %v719_v46, %v484_v48  ;;  %v944_v51 = vpop.f32.mrb[1].mxu1 }
 0x18b   : > { %725 = vmax.xlane.f32.xlu0 %v1014_v50  ;;  %723 = vst [vmem:[%s202_s28] sm:$0xff] %v1014_v50  ;;  %v739_v52 = vsel %vm738_vm3, %v1014_v50, 0.0 }
 0x18f   : > { %740 = vadd.xlane.f32.xlu0 %v739_v52 }
 0x218   : > { %v726_v53 = vpop.xlane.xlu0 %725 }
 0x219   : > { %v727_v54 = vsub.f32 %v1014_v50, %v726_v53 }
 0x21b   : > { %v728_v55 = vmul.f32 1.442695, %v727_v54 }
 0x21d   : > { %1068 = vpow2.f32 %v728_v55 }
 0x227   : > { %v1069_v56 = vpop.eup %1068 }
 0x228   : > { %730 = vadd.xlane.f32.xlu1 %v1069_v56 }
 0x229   : > { %1085 = shalt.err (!%p1082_p3)
}
 0x22a   : > { %s1086_s19 = scalar_lea.hbm %s1295_s8, 128  ;;  %s1090_s22 = scalar_lea.hbm %s1340_s3, 256 }
 0x22b   : > { %p1087_p4 = scmp.ne.s32.totalorder %s1295_s8, %s1086_s19  ;;  %p1091_p9 = scmp.lt.u32.totalorder %s1295_s8, %s1340_s3 }
 0x22c   : > { %p1092_p10 = scmp.lt.u32.totalorder %s1090_s22, %s1086_s19  ;;  %p1094_p12 = scmp.lt.u32.totalorder %s1086_s19, %s1295_s8 }
 0x22d   : > { %p1088_p7 = pnand %p1087_p4, %p1204_p5 }
 0x22e   : > { %p1093_p11 = por %p1092_p10, %p1091_p9 }
 0x22f   : > { %p1089_p8 = pneg %p1088_p7 }
 0x230   : > { %p1095_p13 = por %p1094_p12, %p1093_p11 }
 0x232   : > { %p1096_p0 = pnand %p1095_p13, %p1089_p8 }
 0x234   : > { %1099 = shalt.err (!%p1096_p0)
}
 0x235   : > { %1023 = dma.vmem_to_hbm [thread:$0]  (%p1204_p5), %s768_s30, 128, %s1295_s8, %s750_s9   ;;  %vm742_vm4 = vcmp.ne.s32.totalorder %v1267_v36, 4294967295  ;;  %v741_v62 = vpop.xlane.xlu0 %740  ;;  %vm747_vm5 = vcmask 7168  }
 0x236   : > { %v877_v61 = vsel %vm742_vm4, 1.0, %v1139_v17  ;;  %s220_s5 = scalar_lea.vmem %s1341_s4, %s1224_s6 }
 0x2b5   : > { %v731_v57 = vpop.xlane.xlu1 %730 }
 0x2b6   : > { %1070 = vlog2.f32 %v731_v57 }
 0x2c0   : > { %v1071_v58 = vpop.eup %1070 }
 0x2c1   : > { %v733_v59 = vmul.f32 0.6931472, %v1071_v58 }
 0x2c3   : > { %v734_v60 = vadd.f32 %v733_v59, %v726_v53 }
 0x2c5   : > { %v745_v63 = vsub.f32 %v734_v60, %v741_v62 }
 0x2c7   : > { %v746_v0 = vmul.f32 %v877_v61, %v745_v63 }
 0x2c9   : > { %748 = vst.msk [vmem:[%s220_s5] sm:$0xff] %vm747_vm5, %v746_v0 }
 0x2ca PF: > { %p1029_p5 = scmp.ge.s32.totalorder %s1134_s18, 2  ;;  %s782_s25 = sand.u32 1, %s1122_s15  }
 0x2cb   : > { %s783_s30 = scalar_lea.sflag [#allocation3], %s782_s25 }
 0x2cc   : > { %p1026_p1 = pnand %p1029_p5, %p1208_p6 }
 0x2ce   : > { %1117 = dma.done.wait (!%p1026_p1), %s783_s30, 128  }
 0x2cf   : > { %1119 = vsyncadd (!%p1026_p1), %s783_s30, 4294967168  ;;  %p15_p2 = scmp.ge.s32.totalorder %s1191_s21, 4   ;;  %s1344_s15 = smov %s1126_s16 }
 0x2d0   : > { %s1345_s16 = smov %s1130_s17  ;;  %s1346_s17 = smov %s1202_s24 }
 0x2d1   : > { %s1347_s18 = smov %s1191_s21  ;;  %17 = sbr.rel (!%p15_p2) target bundleno = 3 (0x3), region = 82 }
 0x2d8   :  { %795 = vsyncpa [#allocation3], 1 }
 0x2d9   :  { %797 = vsyncpa [#allocation3 + $0x1], 1 }

</bundles_post_ra>
